<compile_context>
chip_gen: v5e
topology: v5e:2x2
jax: 0.10.0
libtpu: 0.0.40
codegen_flags: <defaults>
</compile_context>

<pallas_src>
import jax
import jax.numpy as jnp
from jax.experimental import pallas as pl
from jax.experimental.pallas import tpu as pltpu


def _round_up(x, m):
    return ((x + m - 1) // m) * m


def _pick_vmem_limit_bytes():
    """48 MiB on 64-MiB-VMEM parts (v7x), up to 96 MiB on 128-MiB parts (v5e/v6e)."""
    cap = 128 * 1024 * 1024
    try:
        cap = int(pltpu.get_tpu_info().vmem_capacity_bytes)
    except Exception:
        pass
    return min(96 * 1024 * 1024, max(32 * 1024 * 1024, (3 * cap) // 4))


def _inner_product_decoder_kernel(z_row_ref, zt_col_ref, adj_ref):
    # z_row_ref:  (TM, D) tile of rows of z
    # zt_col_ref: (D, TN) tile of z.T (columns of the output)
    # adj_ref:    (TM, TN) output tile
    logits = jax.lax.dot_general(
        z_row_ref[...],
        zt_col_ref[...],
        dimension_numbers=(((1,), (0,)), ((), ())),  # (TM,D) @ (D,TN)
        preferred_element_type=jnp.float32,
    )
    adj_ref[...] = jax.nn.sigmoid(logits).astype(adj_ref.dtype)


def inner_product_decoder(z, *, tm=None, tn=None, out_dtype=None,
                          use_bf16_matmul=True):
    """adj = sigmoid(z @ z.T) for z of shape (N, D).

    Eval-mode dropout == identity.  Matmul inputs are cast to bf16 by default
    (f32 accumulation + f32 sigmoid); for N > 512 the output also defaults to
    bf16 to halve the dominant N^2 HBM write traffic.  Pass
    use_bf16_matmul=False and/or out_dtype=jnp.float32 for f32 parity with the
    PyTorch reference.
    """
    N, D = z.shape

    # Matmul input precision (accumulation is always f32).
    zm = z
    if use_bf16_matmul and z.dtype == jnp.float32:
        zm = z.astype(jnp.bfloat16)

    # Output dtype: bf16 by default on the large-N (memory-bound) path when the
    # matmul itself runs in bf16; otherwise keep the input dtype.
    if out_dtype is None:
        out_dtype = zm.dtype if N > 512 else z.dtype
    out_dtype = jnp.dtype(out_dtype)

    # Tile selection: lane-dense output tiles (tn mult. of 128, tm mult. of 8),
    # clamped to the problem size.  512x2048 double-buffered fits comfortably
    # in the 48 MiB budget that is safe even on v7x (64 MiB VMEM).
    # Small problems use a single full-array block.
    if tm is None:
        tm = N if N <= 512 else min(512, _round_up(N, 8))
    if tn is None:
        tn = N if N <= 512 else min(2048, _round_up(N, 128))

    # Column operand pre-transposed once in the wrapper -> natural (K, N)
    # layout for the MXU, no per-tile transpose in the kernel.
    zt = zm.T  # (D, N)

    grid_m = pl.cdiv(N, tm)
    grid_n = pl.cdiv(N, tn)
    grid = (grid_m, grid_n)

    in_bytes = zm.dtype.itemsize
    out_bytes = out_dtype.itemsize
    mp, np_ = grid_m * tm, grid_n * tn  # tile-covered extents (incl. boundary slack)
    cost = pl.CostEstimate(
        flops=2 * mp * np_ * D,
        transcendentals=mp * np_,
        bytes_accessed=(N * D * in_bytes              # row operand (resident per band)
                        + grid_m * N * D * in_bytes   # column operand re-read per band
                        + N * N * out_bytes),         # output writes (dominant)
    )

    return pl.pallas_call(
        _inner_product_decoder_kernel,
        out_shape=jax.ShapeDtypeStruct((N, N), out_dtype),
        grid_spec=pltpu.PrefetchScalarGridSpec(
            num_scalar_prefetch=0,
            grid=grid,
            in_specs=[
                # row tile of z — block index constant across inner j loop
                pl.BlockSpec((tm, D), lambda i, j: (i, 0)),
                # column tile of z.T
                pl.BlockSpec((D, tn), lambda i, j: (0, j)),
            ],
            out_specs=pl.BlockSpec((tm, tn), lambda i, j: (i, j)),
        ),
        compiler_params=pltpu.CompilerParams(
            dimension_semantics=("parallel", "parallel"),
            vmem_limit_bytes=_pick_vmem_limit_bytes(),
        ),
        cost_estimate=cost,
    )(zm, zt)


if __name__ == "__main__":
    key = jax.random.PRNGKey(0)
    key_small, key_big = jax.random.split(key)

    # --- Small case: single full-array block path (N=32, D=16), f32 output. --
    z = jax.random.normal(key_small, (32, 16), dtype=jnp.float32)
    adj = jax.block_until_ready(inner_product_decoder(z))

    zb = z.astype(jnp.bfloat16)
    ref_bf16 = jax.nn.sigmoid(
        jax.lax.dot_general(zb, zb, (((1,), (1,)), ((), ())),
                            preferred_element_type=jnp.float32))
    ref_f32 = jax.nn.sigmoid(z @ z.T)
    assert adj.shape == (32, 32) and adj.dtype == jnp.float32
    assert jnp.allclose(adj, ref_bf16, atol=1e-3, rtol=1e-3)
    assert jnp.allclose(adj, ref_f32, atol=3e-2)  # bf16-input rounding only

    # --- Large ragged case: exercises tiled path with partial boundary blocks
    #     on both grid axes (N=650 -> tm=512, tn=768) and bf16 output. --------
    z2 = jax.random.normal(key_big, (650, 64), dtype=jnp.float32)
    adj2 = jax.block_until_ready(inner_product_decoder(z2))

    z2b = z2.astype(jnp.bfloat16)
    ref2 = jax.nn.sigmoid(
        jax.lax.dot_general(z2b, z2b, (((1,), (1,)), ((), ())),
                            preferred_element_type=jnp.float32))
    assert adj2.shape == (650, 650) and adj2.dtype == jnp.bfloat16
    assert jnp.allclose(adj2.astype(jnp.float32), ref2, atol=1e-2, rtol=1e-2)

    # Optional f32-parity path (no bf16 anywhere) on the tiled shape.
    adj3 = jax.block_until_ready(
        inner_product_decoder(z2, use_bf16_matmul=False, out_dtype=jnp.float32))
    ref3 = jax.nn.sigmoid(z2 @ z2.T)
    assert adj3.dtype == jnp.float32
    assert jnp.allclose(adj3, ref3, atol=1e-5, rtol=1e-5)

    print("KERNEL_OK")
</pallas_src>

<mosaic_0001>
module attributes {stable_mosaic.version = 11 : i64} {
  func.func @_inner_product_decoder_kernel(%arg0: i32, %arg1: i32, %arg2: memref<32x16xbf16, #tpu.memory_space<vmem>>, %arg3: memref<16x32xbf16, #tpu.memory_space<vmem>>, %arg4: memref<32x32xf32, #tpu.memory_space<vmem>>) attributes {dimension_semantics = [#tpu.dimension_semantics<parallel>, #tpu.dimension_semantics<parallel>], iteration_bounds = array<i64: 1, 1>, scalar_prefetch = 0 : i64, scratch_operands = 0 : i64, tpu.core_type = #tpu.core_type<tc>, window_params = [{transform_indices = @transform_0, window_bounds = array<i64: 32, 16>}, {transform_indices = @transform_1, window_bounds = array<i64: 16, 32>}, {transform_indices = @transform_2, window_bounds = array<i64: 32, 32>}]} {
    %c0 = arith.constant 0 : index
    %c0_0 = arith.constant 0 : index
    %0 = vector.load %arg2[%c0, %c0_0] : memref<32x16xbf16, #tpu.memory_space<vmem>>, vector<32x16xbf16>
    %c0_1 = arith.constant 0 : index
    %c0_2 = arith.constant 0 : index
    %1 = vector.load %arg3[%c0_1, %c0_2] : memref<16x32xbf16, #tpu.memory_space<vmem>>, vector<16x32xbf16>
    %cst = arith.constant dense<0.000000e+00> : vector<32x32xf32>
    %2 = tpu.matmul %0, %1, %cst {dimension_numbers = #tpu.dot_dimension_numbers<[1], [0], [0], [1], [0, 0, 1, 1], [], []>} : vector<32x16xbf16>, vector<16x32xbf16>, vector<32x32xf32> -> vector<32x32xf32>
    %3 = arith.negf %2 : vector<32x32xf32>
    %4 = math.exp %3 : vector<32x32xf32>
    %cst_3 = arith.constant 1.000000e+00 : f32
    %5 = vector.broadcast %cst_3 : f32 to vector<32x32xf32>
    %6 = arith.addf %5, %4 : vector<32x32xf32>
    %7 = arith.divf %5, %6 : vector<32x32xf32>
    %c0_4 = arith.constant 0 : index
    %c0_5 = arith.constant 0 : index
    %8 = vector.load %arg4[%c0_4, %c0_5] : memref<32x32xf32, #tpu.memory_space<vmem>>, vector<32x32xf32>
    tpu.vector_store %arg4[%c0_4, %c0_5], %7 {strides = array<i32>} : memref<32x32xf32, #tpu.memory_space<vmem>>, vector<32x32xf32>,
    return
  }
  func.func @transform_0(%arg0: i32, %arg1: i32) -> (i32, i32) {
    %c0_i32 = arith.constant 0 : i32
    %c0_i32_0 = arith.constant 0 : i32
    return %arg0, %c0_i32 : i32, i32
  }
  func.func @transform_1(%arg0: i32, %arg1: i32) -> (i32, i32) {
    %c0_i32 = arith.constant 0 : i32
    %c0_i32_0 = arith.constant 0 : i32
    return %c0_i32, %arg1 : i32, i32
  }
  func.func @transform_2(%arg0: i32, %arg1: i32) -> (i32, i32) {
    %c0_i32 = arith.constant 0 : i32
    return %arg0, %arg1 : i32, i32
  }
}

</mosaic_0001>

<bundles_post_ra>
// kernel: tpu_custom_call.1
= control target key start
LH: loop header
LB: loop body
LE: loop exit
PB: predicated region body
PF: predicated region fallthrough
CT: control target
= control target key end

     0   :  { %s261_s0 = inlined_call_operand.vmem [shape: bf16[32,16], index: 0, kind: input, shape index: {}]   ;;  %s262_s1 = inlined_call_operand.vmem [shape: bf16[16,32], index: 1, kind: input, shape index: {}]   ;;  %s263_s2 = inlined_call_operand.hbm [shape: f32[32,32], index: 2, kind: output, shape index: {}]  }
   0x1   :  { %v180_v0 = vld [vmem:[%s262_s1] sm:$0xff]  ;;  %v179_v2 = vld [vmem:[%s261_s0 + $0x8] sm:$0xff] }
   0x2   :  { %v178_v1 = vld [vmem:[%s261_s0] sm:$0xff] }
   0x3   :  { %7 = vsyncpa [#allocation3], 0  ;;  %49 = vmatpush.bf16.msra.mxu0 %v180_v0  ;;  %181 = vmatpush.bf16.msra.mxu1 %v180_v0  ;;  %vm35_vm0 = vcmask 130048   ;;  %vm137_vm5 = vcmask 261120   ;;  %s227_s0 = smov [#allocation2]   ;;  %s148_s17 = sshll.u32 %s263_s2, 4  ;;  %s149_s17 = int_to_ptr.hbm [resolvable:$true] %s148_s17 }
   0x4   :  { %s146_s1 = sshll.u32 %s227_s0, 4  ;;  %s228_s18 = smov 128   ;;  %s147_s1 = int_to_ptr.vmem [resolvable:$true] %s146_s1 }
   0x5   :  { %s229_s19 = smov 8  }
   0x6   :  { %172 = vmatmul.msk.bf16.vlgmr.msra.gmra.mxu0 %vm35_vm0, %v178_v1  ;;  %173 = vmatmul.msk.bf16.vlgmr.msra.gmra.mxu1 %vm35_vm0, %v179_v2 }
  0x83   :  { %v51_v3 = vpop.f32.mrf.mxu0  ;;  %v56_v4 = vpop.f32.mrf.mxu1 }
  0x84   :  { %v174_v5 = vmul.f32 -1.442695, %v51_v3  ;;  %v176_v6 = vmul.f32 -1.442695, %v56_v4 }
  0x86   :  { %185 = vpow2.f32 %v174_v5 }
  0x87   :  { %187 = vpow2.f32 %v176_v6 }
  0x8b   :  { %v53_v7 = vpop.f32.mrf.mxu0  ;;  %v58_v8 = vpop.f32.mrf.mxu1 }
  0x8c   :  { %v186_v9 = vpop.eup %185  ;;  %v175_v10 = vmul.f32 -1.442695, %v53_v7  ;;  %v177_v13 = vmul.f32 -1.442695, %v58_v8 }
  0x8d   :  { %v188_v11 = vpop.eup %187  ;;  %v73_v12 = vadd.f32 1.0, %v186_v9 }
  0x8e   :  { %v75_v14 = vadd.f32 1.0, %v188_v11  ;;  %189 = vpow2.f32 %v175_v10 }
  0x8f   :  { %191 = vrcp.f32 %v73_v12  ;;  %v86_v24 = vand.u32 2147483647, %v73_v12  ;;  %v88_v25 = vand.u32 2147483648, %v73_v12  ;;  %vm82_vm3 = vweird.f32 %v73_v12 }
  0x90   :  { %193 = vrcp.f32 %v75_v14  ;;  %v118_v28 = vand.u32 2147483648, %v75_v14  ;;  %v116_v30 = vand.u32 2147483647, %v75_v14  ;;  %vm112_vm6 = vweird.f32 %v75_v14 }
  0x91   :  { %195 = vpow2.f32 %v177_v13  ;;  %v89_v33 = vor.u32 1.1754944e-38, %v88_v25  ;;  %vm87_vm7 = vcmp.eq.f32.partialorder %v86_v24, 8.507059e+37 }
  0x92   :  { %v119_v36 = vor.u32 1.1754944e-38, %v118_v28  ;;  %vm117_vm9 = vcmp.eq.f32.partialorder %v116_v30, 8.507059e+37 }
  0x94   :  { %v190_v15 = vpop.eup %189 }
  0x95   :  { %v192_v16 = vpop.eup %191  ;;  %v74_v17 = vadd.f32 1.0, %v190_v15 }
  0x96   :  { %v194_v18 = vpop.eup %193  ;;  %v78_v19 = vmul.f32 %v192_v16, %v73_v12  ;;  %vm83_vm1 = vweird.f32 %v192_v16 }
  0x97   :  { %v196_v20 = vpop.eup %195  ;;  %v108_v21 = vmul.f32 %v194_v18, %v75_v14  ;;  %197 = vrcp.f32 %v74_v17  ;;  %vm113_vm2 = vweird.f32 %v194_v18  ;;  %vm84_vm4 = vmor %vm82_vm3, %vm83_vm1  ;;  %v103_v43 = vand.u32 2147483648, %v74_v17 }
  0x98   :  { %v79_v22 = vsub.f32 1.0, %v78_v19  ;;  %v76_v23 = vadd.f32 1.0, %v196_v20  ;;  %vm114_vm8 = vmor %vm112_vm6, %vm113_vm2  ;;  %v101_v46 = vand.u32 2147483647, %v74_v17  ;;  %vm97_vm11 = vweird.f32 %v74_v17 }
  0x99   :  { %v109_v26 = vsub.f32 1.0, %v108_v21  ;;  %v104_v50 = vor.u32 1.1754944e-38, %v103_v43 }
  0x9a   :  { %v80_v27 = vmul.f32 %v192_v16, %v79_v22  ;;  %199 = vrcp.f32 %v76_v23  ;;  %v133_v49 = vand.u32 2147483648, %v76_v23  ;;  %v131_v52 = vand.u32 2147483647, %v76_v23 }
  0x9b   :  { %v110_v29 = vmul.f32 %v194_v18, %v109_v26  ;;  %vm102_vm14 = vcmp.eq.f32.partialorder %v101_v46, 8.507059e+37  ;;  %vm127_vm15 = vweird.f32 %v76_v23 }
  0x9c   :  { %v81_v31 = vadd.f32 %v192_v16, %v80_v27  ;;  %v134_v56 = vor.u32 1.1754944e-38, %v133_v49  ;;  %vm132_vm1 = vcmp.eq.f32.partialorder %v131_v52, 8.507059e+37 }
  0x9d   :  { %v198_v32 = vpop.eup %197  ;;  %v111_v34 = vadd.f32 %v194_v18, %v110_v29 }
  0x9e   :  { %v85_v35 = vsel %vm84_vm4, %v192_v16, %v81_v31  ;;  %v93_v37 = vmul.f32 %v198_v32, %v74_v17  ;;  %vm98_vm10 = vweird.f32 %v198_v32 }
  0x9f   :  { %v90_v38 = vsel %vm87_vm7, %v89_v33, %v85_v35  ;;  %v115_v39 = vsel %vm114_vm8, %v194_v18, %v111_v34  ;;  %vm99_vm12 = vmor %vm97_vm11, %vm98_vm10 }
  0xa0   :  { %v200_v40 = vpop.eup %199  ;;  %138 = vst.msk [vmem:[#allocation2] sm:$0xff] %vm137_vm5, %v90_v38  ;;  %v120_v41 = vsel %vm117_vm9, %v119_v36, %v115_v39  ;;  %v94_v42 = vsub.f32 1.0, %v93_v37 }
  0xa1   :  { %140 = vst.msk [vmem:[#allocation2 + $0x10] sm:$0xff] %vm137_vm5, %v120_v41  ;;  %v123_v44 = vmul.f32 %v200_v40, %v76_v23  ;;  %vm128_vm13 = vweird.f32 %v200_v40 }
  0xa2   :  { %v95_v45 = vmul.f32 %v198_v32, %v94_v42  ;;  %vm129_vm0 = vmor %vm127_vm15, %vm128_vm13 }
  0xa3   :  { %v124_v47 = vsub.f32 1.0, %v123_v44 }
  0xa4   :  { %v96_v48 = vadd.f32 %v198_v32, %v95_v45 }
  0xa5   :  { %v125_v51 = vmul.f32 %v200_v40, %v124_v47 }
  0xa6   :  { %v100_v53 = vsel %vm99_vm12, %v198_v32, %v96_v48 }
  0xa7   :  { %v105_v54 = vsel %vm102_vm14, %v104_v50, %v100_v53  ;;  %v126_v55 = vadd.f32 %v200_v40, %v125_v51 }
  0xa8   :  { %139 = vst.msk [vmem:[#allocation2 + $0x8] sm:$0xff] %vm137_vm5, %v105_v54 }
  0xa9   :  { %v130_v57 = vsel %vm129_vm0, %v200_v40, %v126_v55 }
  0xaa   :  { %v135_v58 = vsel %vm132_vm1, %v134_v56, %v130_v57 }
  0xab   :  { %141 = vst.msk [vmem:[#allocation2 + $0x18] sm:$0xff] %vm137_vm5, %v135_v58 }
  0xac   :  { %154 = dma.vmem_to_hbm [thread:$0]  %s147_s1, 512, %s149_s17, [#allocation3], %s228_s18, %s228_s18, %s229_s19  }
  0xad   :  { %225 = dma.done.wait [#allocation3], 512  }
  0xae   :  { %226 = vsyncadd [#allocation3], 4294966784 }
  0xaf   :  { %159 = vsyncpa [#allocation3], 1 }

</bundles_post_ra>
